<compile_context>
chip_gen: v6e
topology: v6e:2x2x1
jax: 0.10.0
libtpu: 0.0.40
codegen_flags: <defaults>
</compile_context>

<pallas_src>
import jax
import jax.numpy as jnp
from jax.experimental import pallas as pl
from jax.experimental.pallas import tpu as pltpu

_SUBLANE = 8
# VMEM cost of an output block (block_rows, 1) is lane-padded to 128 lanes:
# block_rows * 128 * 4 B per buffer, double-buffered by the pipeline.
# 8192 rows -> 4 MiB/buffer, 8 MiB total: fits every generation's default
# scoped VMEM (v5e 16 MiB, v6e/v7x 32 MiB) with headroom.
_MAX_BLOCK_ROWS = 8192
# Below this, pallas_call launch + grid overhead exceeds the whole fill.
_FAST_PATH_N = 32768


def _round_up(v, m):
    return ((v + m - 1) // m) * m


def _fill_kernel(var_ref, out_ref):
    # var_ref: (1,) f32 in SMEM; out_ref: (block_rows, 1) f32 block in VMEM.
    s = jnp.exp(var_ref[0] * 10.0)                                  # scalar exp
    out_ref[...] = jnp.full(out_ref.shape, s, dtype=out_ref.dtype)  # splat fill


def _pallas_fill(n, variance_f32):
    """Fill an (n, 1) f32 array with exp(variance * 10) via a Pallas kernel."""
    var1d = jnp.reshape(variance_f32, (1,))  # 1-D SMEM ref -> 4 B, not 4 KiB

    # >= 2 tiles when possible (v7x megacore), capped by the VMEM budget.
    half = -(-n // 2)  # cdiv(n, 2)
    block_rows = min(_round_up(half, _SUBLANE), _MAX_BLOCK_ROWS)
    block_rows = max(block_rows, _SUBLANE)
    block_rows = min(block_rows, _round_up(n, _SUBLANE))
    grid_len = pl.cdiv(n, block_rows)

    return pl.pallas_call(
        _fill_kernel,
        out_shape=jax.ShapeDtypeStruct((n, 1), jnp.float32),
        grid=(grid_len,),
        in_specs=[pl.BlockSpec(memory_space=pltpu.SMEM)],   # scalar param, untiled
        out_specs=pl.BlockSpec((block_rows, 1), lambda i: (i, 0)),
        compiler_params=pltpu.CompilerParams(
            dimension_semantics=("parallel",)),
        cost_estimate=pl.CostEstimate(
            flops=0, transcendentals=int(grid_len), bytes_accessed=4 * n + 4),
    )(var1d)


def _forward_impl(x, variance):
    n = int(x.shape[0])
    var_f32 = jnp.reshape(jnp.asarray(variance, dtype=jnp.float32), ())
    if n == 0:
        return jnp.zeros((0, 1), jnp.float32)
    if n < _FAST_PATH_N:
        # Fast path: let XLA fuse the splat into the consumer.
        return jnp.full((n, 1), jnp.exp(var_f32 * 10.0), dtype=jnp.float32)
    return _pallas_fill(n, var_f32)


@jax.custom_vjp
def single_variance_forward(x, variance):
    """JAX/Pallas equivalent of SingleVarianceNetwork.forward.

    Args:
      x: array whose leading dim is the batch size N (values unused, matching
         the PyTorch module which only calls len(x)).
      variance: scalar parameter (Python float or 0-d array).

    Returns:
      (N, 1) f32 array filled with exp(variance * 10).
    """
    return _forward_impl(x, variance)


def _fwd(x, variance):
    return _forward_impl(x, variance), (x, variance)


def _bwd(res, g):
    x, variance = res
    v = jnp.asarray(variance, jnp.float32)
    dvar = 10.0 * jnp.exp(v * 10.0) * jnp.sum(g.astype(jnp.float32))
    dvar = jnp.broadcast_to(dvar, jnp.shape(variance)).astype(v.dtype)
    return jnp.zeros_like(x), dvar


single_variance_forward.defvjp(_fwd, _bwd)


if __name__ == "__main__":
    key = jax.random.PRNGKey(0)

    # Deterministic parameter init (module's __init__ takes init_val).
    init_val = 0.3
    variance = jnp.asarray(init_val, dtype=jnp.float32)
    expected_val = jnp.exp(variance * 10.0)

    # Small example input consistent with the module (rays/points, xyz).
    N, D = 8, 3
    x = jax.random.normal(key, (N, D), dtype=jnp.float32)

    # 1) Exercise the Pallas kernel itself at the small shape.
    out_pallas = jax.block_until_ready(_pallas_fill(N, variance))
    ref_small = jnp.ones((N, 1), jnp.float32) * expected_val
    assert out_pallas.shape == (N, 1)
    assert jnp.allclose(out_pallas, ref_small, rtol=1e-6, atol=1e-6)

    # 2) Public forward at small N (fast path).
    out_small = jax.block_until_ready(single_variance_forward(x, variance))
    assert out_small.shape == (N, 1)
    assert jnp.allclose(out_small, ref_small, rtol=1e-6, atol=1e-6)

    # 3) Public forward at a large, multi-tile N (gridded Pallas path,
    #    including a partial final block).
    N_big = 300_000
    x_big = jnp.zeros((N_big, D), jnp.float32)
    out_big = jax.block_until_ready(single_variance_forward(x_big, variance))
    assert out_big.shape == (N_big, 1)
    assert jnp.allclose(out_big, expected_val, rtol=1e-6, atol=1e-6)

    # 4) Parameter stays trainable: d/dvar sum(out) = N * 10 * exp(10*var).
    grad_var = jax.block_until_ready(
        jax.grad(lambda v: jnp.sum(single_variance_forward(x, v)))(variance))
    expected_grad = N * 10.0 * expected_val
    assert jnp.allclose(grad_var, expected_grad, rtol=1e-4)

    print("KERNEL_OK")
</pallas_src>

<mosaic_0001>
module attributes {stable_mosaic.version = 11 : i64} {
  func.func @_fill_kernel(%arg0: i32, %arg1: memref<1xf32, #tpu.memory_space<smem>>, %arg2: memref<8x1xf32, #tpu.memory_space<vmem>>) attributes {dimension_semantics = [#tpu.dimension_semantics<parallel>], iteration_bounds = array<i64: 1>, scalar_prefetch = 0 : i64, scratch_operands = 0 : i64, tpu.core_type = #tpu.core_type<tc>, window_params = [{transform_indices = @transform_0, window_bounds = array<i64: 1>}, {transform_indices = @transform_1, window_bounds = array<i64: 8, 1>}]} {
    %c0 = arith.constant 0 : index
    %0 = memref.load %arg1[%c0] : memref<1xf32, #tpu.memory_space<smem>>
    %cst = arith.constant 1.000000e+01 : f32
    %1 = arith.mulf %0, %cst : f32
    %2 = math.exp %1 : f32
    %3 = vector.broadcast %2 : f32 to vector<8x1xf32>
    %c0_0 = arith.constant 0 : index
    %c0_1 = arith.constant 0 : index
    %4 = vector.load %arg2[%c0_0, %c0_1] : memref<8x1xf32, #tpu.memory_space<vmem>>, vector<8x1xf32>
    tpu.vector_store %arg2[%c0_0, %c0_1], %3 {strides = array<i32>} : memref<8x1xf32, #tpu.memory_space<vmem>>, vector<8x1xf32>,
    return
  }
  func.func @transform_0(%arg0: i32) -> i32 {
    %c0_i32 = arith.constant 0 : i32
    %c0_i32_0 = arith.constant 0 : i32
    return %c0_i32 : i32
  }
  func.func @transform_1(%arg0: i32) -> (i32, i32) {
    %c0_i32 = arith.constant 0 : i32
    %c0_i32_0 = arith.constant 0 : i32
    return %arg0, %c0_i32 : i32, i32
  }
}

</mosaic_0001>

<bundles_post_ra>
// kernel: tpu_custom_call.1
= control target key start
LH: loop header
LB: loop body
LE: loop exit
PB: predicated region body
PF: predicated region fallthrough
CT: control target
= control target key end

     0   :  { %vm16_vm0 = vcmask 7168   ;;  %s42_s0 = inlined_call_operand.<no memory space> [shape: f32[1], index: 0, kind: input, shape index: {}]   ;;  %s43_s1 = inlined_call_operand.vmem [shape: f32[8,1], index: 1, kind: output, shape index: {}]  }
   0x1   :  { %s10_s8 = smul.f32 10.0, %s42_s0 }
   0x3   :  { %v11_v0 = vstv %s10_s8 }
   0x4   :  { %v12_v1 = vmul.f32 1.442695, %v11_v0 }
   0x6   :  { %24 = vpow2.f32 %v12_v1 }
  0x13   :  { %v25_v2 = vpop.eup %24 }
  0x14   :  { %22 = vpush %v25_v2 }
  0x45   :  { %s23_s9 = spop %22 }
  0x46   :  { %v15_v3 = vstv %s23_s9 }
  0x47   :  { %17 = vst.msk [vmem:[%s43_s1] sm:$0xff] %vm16_vm0, %v15_v3 }

</bundles_post_ra>
